<compile_context>
chip_gen: v7x
topology: tpu7x:2x2x1
jax: 0.10.0
libtpu: 0.0.40
codegen_flags: <defaults>
</compile_context>

<pallas_src>
import functools

import jax
import jax.numpy as jnp
from jax.experimental import pallas as pl
from jax.experimental.pallas import tpu as pltpu


# --------------------------------------------------------------------------
# Kernel 1: tiled linear projection  o = x @ W^T + b
# --------------------------------------------------------------------------
def _linear_kernel(x_ref, w_ref, b_ref, o_ref):
    # x: (TM, IN), w: (OUT, IN) in PyTorch layout; contraction on dim 1 of
    # both operands -> no in-kernel transpose / relayout.  b: (1, OUT).
    o_ref[...] = (
        jax.lax.dot_general(
            x_ref[...], w_ref[...],
            dimension_numbers=(((1,), (1,)), ((), ())),
            preferred_element_type=jnp.float32,
        )
        + b_ref[...]
    ).astype(o_ref.dtype)


def linear(x, w, b, *, tile_m=512):
    """o = x @ w.T + b  with x: (M, IN), w: (OUT, IN), b: (OUT,)."""
    m, in_dim = x.shape
    out_dim = w.shape[0]
    # Full extent if small, otherwise a sublane-aligned row tile; the last
    # (possibly partial) tile is handled by Pallas.
    tm = m if m <= tile_m else tile_m
    grid = (pl.cdiv(m, tm),)
    return pl.pallas_call(
        _linear_kernel,
        grid=grid,
        in_specs=[
            pl.BlockSpec((tm, in_dim), lambda i: (i, 0)),
            pl.BlockSpec((out_dim, in_dim), lambda i: (0, 0)),
            pl.BlockSpec((1, out_dim), lambda i: (0, 0)),
        ],
        out_specs=pl.BlockSpec((tm, out_dim), lambda i: (i, 0)),
        out_shape=jax.ShapeDtypeStruct((m, out_dim), jnp.float32),
        compiler_params=pltpu.CompilerParams(
            dimension_semantics=("parallel",)),
    )(x, w, b.reshape(1, out_dim))


# --------------------------------------------------------------------------
# Kernel 2: fused multi-head attention + output projection + averaged weights
#   grid iterates over blocks of the batch axis; all heads of a batch element
#   are processed in-kernel (amortizes per-step overhead, no per-head HBM
#   traffic, no host transposes).
# --------------------------------------------------------------------------
def _fused_attn_kernel(q_ref, k_ref, v_ref, wot_ref, bo_ref, o_ref, w_ref,
                       *, num_heads):
    # q_ref: (L, NB, E) pre-scaled;  k_ref/v_ref: (S, NB, E)
    # wot_ref: (E, E) = out_proj.weight.T (pre-transposed once on host)
    # bo_ref: (1, E);  o_ref: (L, NB, E);  w_ref: (NB, L, S)
    L, NB, E = q_ref.shape
    S = k_ref.shape[0]
    hd = E // num_heads
    inv_h = 1.0 / num_heads

    q_all = q_ref[...]
    k_all = k_ref[...]
    v_all = v_ref[...]
    wot = wot_ref[...]
    bo = bo_ref[...].astype(jnp.float32)          # (1, E), broadcasts on add

    for b in range(NB):                           # static unroll, NB <= 8
        q_b = q_all[:, b, :]                      # (L, E)
        k_b = k_all[:, b, :]                      # (S, E)
        v_b = v_all[:, b, :]                      # (S, E)
        out_b = bo                                # accumulates bias + sum_h o_h @ Wo_h^T
        w_acc = jnp.zeros((L, S), jnp.float32)
        for h in range(num_heads):                # static unroll over heads
            sl = slice(h * hd, (h + 1) * hd)
            # scores: q_h @ k_h^T  -> (L, S); contraction on dim 1 of both.
            s = jax.lax.dot_general(
                q_b[:, sl], k_b[:, sl],
                dimension_numbers=(((1,), (1,)), ((), ())),
                preferred_element_type=jnp.float32)
            m = jnp.max(s, axis=-1, keepdims=True)
            e = jnp.exp(s - m)
            # one reciprocal, reused for both the stored weights and PV matmul
            p = e * pl.reciprocal(jnp.sum(e, axis=-1, keepdims=True))
            w_acc = w_acc + p
            o_h = jnp.dot(p, v_b[:, sl],
                          preferred_element_type=jnp.float32)        # (L, hd)
            # fused output projection: o_h @ Wo[:, h*hd:(h+1)*hd]^T == o_h @ WoT[sl, :]
            out_b = out_b + jnp.dot(o_h, wot[sl, :],
                                    preferred_element_type=jnp.float32)
        o_ref[:, b, :] = out_b.astype(o_ref.dtype)
        w_ref[b, :, :] = (w_acc * inv_h).astype(w_ref.dtype)


def fused_attention(q, k, v, out_w, out_b, num_heads):
    """q: (L, N, E) pre-scaled, k/v: (S, N, E), out_w: (E, E), out_b: (E,).

    Returns attn_output (L, N, E) and head-averaged weights (N, L, S)."""
    L, N, E = q.shape
    S = k.shape[0]
    # Batch block: whole batch if small, otherwise a sublane-aligned block of 8.
    nb = N if N <= 8 else 8
    grid = (pl.cdiv(N, nb),)
    kernel = functools.partial(_fused_attn_kernel, num_heads=num_heads)
    wot = out_w.T                 # static parameter: pre-transpose once on host
    return pl.pallas_call(
        kernel,
        grid=grid,
        in_specs=[
            pl.BlockSpec((L, nb, E), lambda i: (0, i, 0)),
            pl.BlockSpec((S, nb, E), lambda i: (0, i, 0)),
            pl.BlockSpec((S, nb, E), lambda i: (0, i, 0)),
            pl.BlockSpec((E, E), lambda i: (0, 0)),
            pl.BlockSpec((1, E), lambda i: (0, 0)),
        ],
        out_specs=[
            pl.BlockSpec((L, nb, E), lambda i: (0, i, 0)),
            pl.BlockSpec((nb, L, S), lambda i: (i, 0, 0)),
        ],
        out_shape=(
            jax.ShapeDtypeStruct((L, N, E), jnp.float32),
            jax.ShapeDtypeStruct((N, L, S), jnp.float32),
        ),
        compiler_params=pltpu.CompilerParams(
            dimension_semantics=("parallel",)),
    )(q, k, v, wot, out_b.reshape(1, E))


# --------------------------------------------------------------------------
# Multi-head attention forward
# --------------------------------------------------------------------------
def multihead_attention(query, key, value, params, num_heads):
    """query: (L, N, E), key/value: (S, N, E). Returns ((L,N,E), (N,L,S))."""
    L, N, E = query.shape
    S = key.shape[0]
    head_dim = E // num_heads
    scale = float(head_dim) ** -0.5

    in_w = params["in_proj_weight"]      # (3E, E)
    in_b = params["in_proj_bias"]        # (3E,)
    out_w = params["out_proj_weight"]    # (E, E)
    out_b = params["out_proj_bias"]      # (E,)

    if query is key and key is value:
        # Self-attention: one fused (M, E) x (E, 3E) projection.  The softmax
        # scale is folded into the Q rows of the (static) weight / bias.
        scale_col = jnp.concatenate(
            [jnp.full((E, 1), scale, jnp.float32),
             jnp.ones((2 * E, 1), jnp.float32)], axis=0)
        qkv = linear(query.reshape(L * N, E),
                     in_w * scale_col, in_b * scale_col[:, 0])   # (L*N, 3E)
        q3 = qkv[:, :E].reshape(L, N, E)
        k3 = qkv[:, E:2 * E].reshape(L, N, E)
        v3 = qkv[:, 2 * E:].reshape(L, N, E)
    else:
        wq, wk, wv = in_w[:E], in_w[E:2 * E], in_w[2 * E:]
        bq, bk, bv = in_b[:E], in_b[E:2 * E], in_b[2 * E:]
        q3 = linear(query.reshape(L * N, E),
                    wq * scale, bq * scale).reshape(L, N, E)
        k3 = linear(key.reshape(S * N, E), wk, bk).reshape(S, N, E)
        v3 = linear(value.reshape(S * N, E), wv, bv).reshape(S, N, E)

    return fused_attention(q3, k3, v3, out_w, out_b, num_heads)


# --------------------------------------------------------------------------
# Pure-JAX reference (mirrors PyTorch multi_head_attention_forward defaults)
# --------------------------------------------------------------------------
def reference_mha(query, key, value, params, num_heads):
    L, N, E = query.shape
    S = key.shape[0]
    hd = E // num_heads
    scale = float(hd) ** -0.5
    in_w, in_b = params["in_proj_weight"], params["in_proj_bias"]
    out_w, out_b = params["out_proj_weight"], params["out_proj_bias"]

    q = query.reshape(L * N, E) @ in_w[:E].T + in_b[:E]
    k = key.reshape(S * N, E) @ in_w[E:2 * E].T + in_b[E:2 * E]
    v = value.reshape(S * N, E) @ in_w[2 * E:].T + in_b[2 * E:]
    q = (q * scale).reshape(L, N * num_heads, hd).transpose(1, 0, 2)
    k = k.reshape(S, N * num_heads, hd).transpose(1, 0, 2)
    v = v.reshape(S, N * num_heads, hd).transpose(1, 0, 2)

    s = jnp.einsum("bld,bsd->bls", q, k)
    p = jax.nn.softmax(s, axis=-1)
    o = jnp.einsum("bls,bsd->bld", p, v)
    o = o.transpose(1, 0, 2).reshape(L * N, E)
    out = (o @ out_w.T + out_b).reshape(L, N, E)
    w_avg = p.reshape(N, num_heads, L, S).mean(axis=1)
    return out, w_avg


# --------------------------------------------------------------------------
# Deterministic parameter initialization (mirrors the module's __init__)
# --------------------------------------------------------------------------
def init_params(key, embed_dim):
    E = embed_dim
    k1, k2 = jax.random.split(key)
    # xavier_uniform_ on (3E, E): bound = sqrt(6 / (fan_in + fan_out))
    bound_in = (6.0 / (E + 3 * E)) ** 0.5
    in_proj_weight = jax.random.uniform(
        k1, (3 * E, E), jnp.float32, minval=-bound_in, maxval=bound_in)
    in_proj_bias = jnp.zeros((3 * E,), jnp.float32)
    # nn.Linear default-ish init for out_proj weight; bias reset to 0.
    bound_out = (1.0 / E) ** 0.5
    out_proj_weight = jax.random.uniform(
        k2, (E, E), jnp.float32, minval=-bound_out, maxval=bound_out)
    out_proj_bias = jnp.zeros((E,), jnp.float32)
    return {
        "in_proj_weight": in_proj_weight,
        "in_proj_bias": in_proj_bias,
        "out_proj_weight": out_proj_weight,
        "out_proj_bias": out_proj_bias,
    }


if __name__ == "__main__":
    L, S, N, E, H = 8, 8, 2, 32, 4      # tgt len, src len, batch, embed, heads

    root = jax.random.PRNGKey(0)
    kq, kk, kv, kp = jax.random.split(root, 4)
    query = jax.random.normal(kq, (L, N, E), jnp.float32)
    key = jax.random.normal(kk, (S, N, E), jnp.float32)
    value = jax.random.normal(kv, (S, N, E), jnp.float32)
    params = init_params(kp, E)

    # Cross-attention path (separate Q/K/V projections).
    attn_output, attn_weights = multihead_attention(query, key, value, params, H)
    jax.block_until_ready((attn_output, attn_weights))

    assert attn_output.shape == (L, N, E)
    assert attn_weights.shape == (N, L, S)

    ref_out, ref_w = reference_mha(query, key, value, params, H)
    assert bool(jnp.allclose(attn_output, ref_out, atol=2e-3, rtol=2e-3))
    assert bool(jnp.allclose(attn_weights, ref_w, atol=2e-3, rtol=2e-3))
    # softmax rows of the averaged weights must sum to 1
    assert bool(jnp.allclose(attn_weights.sum(-1), 1.0, atol=1e-3))

    # Self-attention path (single fused QKV projection kernel).
    self_out, self_w = multihead_attention(query, query, query, params, H)
    jax.block_until_ready((self_out, self_w))
    ref_out2, ref_w2 = reference_mha(query, query, query, params, H)
    assert bool(jnp.allclose(self_out, ref_out2, atol=2e-3, rtol=2e-3))
    assert bool(jnp.allclose(self_w, ref_w2, atol=2e-3, rtol=2e-3))

    print("KERNEL_OK")
</pallas_src>

<mosaic_0001>
module attributes {stable_mosaic.version = 11 : i64} {
  func.func @_linear_kernel(%arg0: i32, %arg1: memref<16x32xf32, #tpu.memory_space<vmem>>, %arg2: memref<32x32xf32, #tpu.memory_space<vmem>>, %arg3: memref<1x32xf32, #tpu.memory_space<vmem>>, %arg4: memref<16x32xf32, #tpu.memory_space<vmem>>) attributes {dimension_semantics = [#tpu.dimension_semantics<parallel>], iteration_bounds = array<i64: 1>, scalar_prefetch = 0 : i64, scratch_operands = 0 : i64, tpu.core_type = #tpu.core_type<tc>, window_params = [{transform_indices = @transform_0, window_bounds = array<i64: 16, 32>}, {pipeline_mode = #tpu.pipeline_mode<synchronous>, transform_indices = @transform_1, window_bounds = array<i64: 32, 32>}, {pipeline_mode = #tpu.pipeline_mode<synchronous>, transform_indices = @transform_2, window_bounds = array<i64: 1, 32>}, {transform_indices = @transform_3, window_bounds = array<i64: 16, 32>}]} {
    %c0 = arith.constant 0 : index
    %c0_0 = arith.constant 0 : index
    %0 = vector.load %arg1[%c0, %c0_0] : memref<16x32xf32, #tpu.memory_space<vmem>>, vector<16x32xf32>
    %c0_1 = arith.constant 0 : index
    %c0_2 = arith.constant 0 : index
    %1 = vector.load %arg2[%c0_1, %c0_2] : memref<32x32xf32, #tpu.memory_space<vmem>>, vector<32x32xf32>
    %cst = arith.constant dense<0.000000e+00> : vector<16x32xf32>
    %2 = tpu.matmul %0, %1, %cst {dimension_numbers = #tpu.dot_dimension_numbers<[1], [1], [0], [0], [0, 0, 1, 0], [], []>} : vector<16x32xf32>, vector<32x32xf32>, vector<16x32xf32> -> vector<16x32xf32>
    %c0_3 = arith.constant 0 : index
    %c0_4 = arith.constant 0 : index
    %3 = vector.load %arg3[%c0_3, %c0_4] : memref<1x32xf32, #tpu.memory_space<vmem>>, vector<1x32xf32>
    %4 = vector.broadcast %3 : vector<1x32xf32> to vector<16x32xf32>
    %5 = arith.addf %2, %4 : vector<16x32xf32>
    %c0_5 = arith.constant 0 : index
    %c0_6 = arith.constant 0 : index
    %6 = vector.load %arg4[%c0_5, %c0_6] : memref<16x32xf32, #tpu.memory_space<vmem>>, vector<16x32xf32>
    tpu.vector_store %arg4[%c0_5, %c0_6], %5 {strides = array<i32>} : memref<16x32xf32, #tpu.memory_space<vmem>>, vector<16x32xf32>,
    return
  }
  func.func @transform_0(%arg0: i32) -> (i32, i32) {
    %c0_i32 = arith.constant 0 : i32
    %c0_i32_0 = arith.constant 0 : i32
    return %arg0, %c0_i32 : i32, i32
  }
  func.func @transform_1(%arg0: i32) -> (i32, i32) {
    %c0_i32 = arith.constant 0 : i32
    %c0_i32_0 = arith.constant 0 : i32
    %c0_i32_1 = arith.constant 0 : i32
    return %c0_i32, %c0_i32_0 : i32, i32
  }
  func.func @transform_2(%arg0: i32) -> (i32, i32) {
    %c0_i32 = arith.constant 0 : i32
    %c0_i32_0 = arith.constant 0 : i32
    %c0_i32_1 = arith.constant 0 : i32
    return %c0_i32, %c0_i32_0 : i32, i32
  }
  func.func @transform_3(%arg0: i32) -> (i32, i32) {
    %c0_i32 = arith.constant 0 : i32
    %c0_i32_0 = arith.constant 0 : i32
    return %arg0, %c0_i32 : i32, i32
  }
}

</mosaic_0001>

<bundles_post_ra>
// kernel: tpu_custom_call.1
= control target key start
LH: loop header
LB: loop body
LE: loop exit
PB: predicated region body
PF: predicated region fallthrough
CT: control target
= control target key end

     0   :  { %8 = vsyncpa [#allocation3], 0  ;;  %s362_s0 = inlined_call_operand.hbm [shape: f32[16,32], index: 0, kind: input, shape index: {}]   ;;  %s363_s1 = inlined_call_operand.hbm [shape: f32[32,32], index: 1, kind: input, shape index: {}]   ;;  %s364_s2 = inlined_call_operand.vmem [shape: f32[1,32], index: 2, kind: input, shape index: {}]   ;;  %s365_s3 = inlined_call_operand.hbm [shape: f32[16,32], index: 3, kind: output, shape index: {}]  }
   0x1   :  { %9 = vsyncpa [#allocation6], 0 }
   0x2   :  { %10 = vsyncpa [#allocation4], 0  ;;  %s283_s12 = smov [#allocation2]   ;;  %s211_s16 = scalar_lea.hbm %s362_s0, 256 }
   0x3   :  { %s16_s13 = sshll.u32 %s283_s12, 4  ;;  %p212_p0 = scmp.ne.s32.totalorder %s362_s0, %s211_s16  ;;  %s17_s13 = int_to_ptr.vmem [resolvable:$true] %s16_s13 }
   0x4   :  { %p215_p1 = scmp.lt.u32.totalorder %s211_s16, %s362_s0 }
   0x6   :  { %p217_p2 = pnand %p215_p1, %p212_p0 }
   0x8   :  { %220 = shalt.err (!%p217_p2)
}
   0x9   :  { %s221_s21 = scalar_lea.vmem %s17_s13, 256  ;;  %p226_p4 = scmp.lt.s32.totalorder %s17_s13, %s17_s13 }
   0xa   :  { %p222_p3 = scmp.ne.s32.totalorder %s17_s13, %s221_s21  ;;  %p227_p5 = scmp.lt.s32.totalorder %s221_s21, %s221_s21 }
   0xc   :  { %p228_p6 = por %p227_p5, %p226_p4 }
   0xe   :  { %p229_p7 = pnand %p228_p6, %p222_p3 }
  0x10   :  { %232 = shalt.err (!%p229_p7)
}
  0x11   :  { %s284_s22 = smov 128   ;;  %s285_s23 = smov 8  }
  0x12   :  { %22 = dma.hbm_to_vmem [thread:$0]  %s362_s0, 256, %s17_s13, [#allocation3], %s284_s22, %s284_s22, %s285_s23  }
  0x13   :  { %s286_s26 = smov [#allocation5]   ;;  %s233_s30 = scalar_lea.hbm %s363_s1, 512 }
  0x14   :  { %s28_s27 = sshll.u32 %s286_s26, 4  ;;  %p234_p8 = scmp.ne.s32.totalorder %s363_s1, %s233_s30  ;;  %s29_s27 = int_to_ptr.vmem [resolvable:$true] %s28_s27 }
  0x15   :  { %p237_p9 = scmp.lt.u32.totalorder %s233_s30, %s363_s1 }
  0x17   :  { %p239_p10 = pnand %p237_p9, %p234_p8 }
  0x19   :  { %242 = shalt.err (!%p239_p10)
}
  0x1a   :  { %s243_s8 = scalar_lea.vmem %s29_s27, 512  ;;  %p248_p12 = scmp.lt.s32.totalorder %s29_s27, %s29_s27 }
  0x1b   :  { %p244_p11 = scmp.ne.s32.totalorder %s29_s27, %s243_s8  ;;  %p249_p13 = scmp.lt.s32.totalorder %s243_s8, %s243_s8 }
  0x1d   :  { %p250_p0 = por %p249_p13, %p248_p12 }
  0x1f   :  { %p251_p1 = pnand %p250_p0, %p244_p11 }
  0x21   :  { %254 = shalt.err (!%p251_p1)
}
  0x22   :  { %34 = dma.hbm_to_vmem [thread:$0]  %s363_s1, 512, %s29_s27, [#allocation6], %s284_s22, %s284_s22, %s285_s23  }
  0x23   :  { %277 = dma.done.wait [#allocation3], 256  }
  0x24   :  { %278 = vsyncadd [#allocation3], 4294967040 }
  0x25   :  { %279 = dma.done.wait [#allocation6], 512  }
  0x26   :  { %280 = vsyncadd [#allocation6], 4294966784  ;;  %vm56_vm0 = vcmask 261120   ;;  %v45_v0 = vld [vmem:[#allocation5] sm:$0xff]  ;;  %v46_v1 = vld [vmem:[#allocation5 + $0x8] sm:$0xff]  ;;  %s287_s11 = smov [#allocation7]  }
  0x27   :  { %vm195_vm1 = vmpackc.low %vm56_vm0, %vm56_vm0  ;;  %v47_v2 = vld [vmem:[#allocation5 + $0x10] sm:$0xff]  ;;  %v194_v3 = vpack.c.bf16 %v46_v1, %v45_v0  ;;  %v48_v4 = vld [vmem:[#allocation5 + $0x18] sm:$0xff]  ;;  %s157_s12 = sshll.u32 %s287_s11, 4  ;;  %s158_s12 = int_to_ptr.vmem [resolvable:$true] %s157_s12 }
  0x28   :  { %v43_v5 = vld [vmem:[#allocation2] sm:$0xff]  ;;  %v200_v6 = vpack.c.bf16 %v48_v4, %v47_v2  ;;  %v44_v7 = vld [vmem:[#allocation2 + $0x8] sm:$0xff]  ;;  %s255_s13 = scalar_lea.vmem %s158_s12, 256  ;;  %p260_p3 = scmp.lt.s32.totalorder %s158_s12, %s158_s12 }
  0x29   :  { %191 = vmatprep.mubr.msk.f32.mxu0 %vm56_vm0, %v43_v5  ;;  %196 = vmatprep.subr.msk.bf16.mxu0 %vm195_vm1, %v194_v3  ;;  %v170_v8 = vld [vmem:[%s364_s2] ss:$0 sm:$0xff]  ;;  %p256_p2 = scmp.ne.s32.totalorder %s158_s12, %s255_s13  ;;  %p261_p4 = scmp.lt.s32.totalorder %s255_s13, %s255_s13 }
  0x2a   :  { %199 = vmatpush3.bf16.xpose.msk.msra.mxu0 %vm195_vm1, %v194_v3 }
  0x2b   :  { %202 = vmatprep.subr.msk.bf16.mxu0 %vm195_vm1, %v200_v6  ;;  %p262_p5 = por %p261_p4, %p260_p3 }
  0x2d   :  { %p263_p6 = pnand %p262_p5, %p256_p2 }
  0x32   :  { %205 = vmatpush3.bf16.xpose.msk.msra.mxu0 %vm195_vm1, %v200_v6 }
  0x39   :  { %192 = vmatmul.mubr.msk.f32.vlgmr.msra.gmra.mrb[0].mxu0 %vm56_vm0, %v44_v7 }
 0x10c   :  { %v193_v9 = vpop.f32.mrb[0].mxu0 }
 0x10d   :  { %v147_v10 = vadd.f32 %v193_v9, %v170_v8  ;;  %v141_v11 = vpop.f32.mrb[1].mxu0 }
 0x10e   :  { %v142_v12 = vadd.f32 %v170_v8, %v141_v11 }
 0x10f   :  { %151 = vst.msk [vmem:[#allocation7 + $0x8] sm:$0xff] %vm56_vm0, %v147_v10 }
 0x110   :  { %150 = vst.msk [vmem:[#allocation7] sm:$0xff] %vm56_vm0, %v142_v12 }
 0x111   :  { %266 = shalt.err (!%p263_p6)
}
 0x112   :  { %s267_s15 = scalar_lea.hbm %s365_s3, 256 }
 0x113   :  { %p268_p7 = scmp.ne.s32.totalorder %s365_s3, %s267_s15  ;;  %p271_p8 = scmp.lt.u32.totalorder %s267_s15, %s365_s3 }
 0x115   :  { %p273_p9 = pnand %p271_p8, %p268_p7 }
 0x117   :  { %276 = shalt.err (!%p273_p9)
}
 0x118   :  { %163 = dma.vmem_to_hbm [thread:$0]  %s158_s12, 256, %s365_s3, [#allocation4], %s284_s22, %s284_s22, %s285_s23  }
 0x119   :  { %281 = dma.done.wait [#allocation4], 256  }
 0x11a   :  { %282 = vsyncadd [#allocation4], 4294967040 }
 0x11b   :  { %167 = vsyncpa [#allocation3], 1 }
 0x11c   :  { %168 = vsyncpa [#allocation6], 1 }
 0x11d   :  { %169 = vsyncpa [#allocation4], 1 }

</bundles_post_ra>
